<compile_context>
chip_gen: v7x
topology: tpu7x:2x2x1
jax: 0.10.0
libtpu: 0.0.40
codegen_flags: <defaults>
</compile_context>

<pallas_src>
import functools
import math

import jax
import jax.numpy as jnp
from jax.experimental import pallas as pl
from jax.experimental.pallas import tpu as pltpu


def _round_up(x, m):
    return ((x + m - 1) // m) * m


def _default_act_dtype():
    """bf16 activations only where the VPU/EUP have a bf16 path (v6e / v7x)."""
    try:
        kind = jax.devices()[0].device_kind.lower()
    except Exception:
        return jnp.float32
    if ("v6" in kind) or ("v7" in kind) or ("7x" in kind):
        return jnp.bfloat16
    return jnp.float32


def rff_kernel(x_ref, w1_ref, b1_ref, w2_ref, b2_ref, o_ref, acc_ref,
               *, act_dtype, tf):
    f = pl.program_id(1)

    @pl.when(f == 0)
    def _():
        acc_ref[...] = jnp.zeros_like(acc_ref)

    # Layer 1 on the MXU, f32 accumulation regardless of the feed dtype.
    h = jnp.dot(x_ref[...], w1_ref[...], preferred_element_type=jnp.float32)
    h = h + b1_ref[...]                               # (TB, TF), f32
    # tanh on the EUP; bf16 on v6e/v7x halves the vregs pushed through the
    # single EUP slot, f32 elsewhere.
    h = jnp.tanh(h.astype(act_dtype))
    # Layer 2 (F -> 1): VPU multiply against the w2 row (no N=1 MXU matmul),
    # then a split reduction: f32 VPU adds over 128-lane chunks, one XLU
    # cross-lane reduce at the end.
    hw = h * w2_ref[...].astype(act_dtype)            # (TB, TF)
    part = hw[:, 0:128].astype(jnp.float32)
    for c in range(1, tf // 128):
        part = part + hw[:, c * 128:(c + 1) * 128].astype(jnp.float32)
    acc_ref[...] += jnp.sum(part, axis=-1, keepdims=True)

    @pl.when(f == pl.num_programs(1) - 1)
    def _():
        o_ref[...] = (acc_ref[...] + b2_ref[0, 0]).astype(o_ref.dtype)


def _pick_tiles(B, D, F_pad, block_b, itemsize):
    # Batch tile: multiple of 8 sublanes, capped at ceil(B/2) so the grid has
    # at least 2 steps whenever B allows it (keeps v7x's 2nd TC busy).
    tb = max(8, min(block_b, _round_up(pl.cdiv(B, 2), 8)))
    # Feature tile: largest 128-multiple divisor of F_pad whose W1 block +
    # (tb, tf) activation stay under a v7x-safe VMEM budget.
    budget = 24 << 20
    tf = 128
    for cand in range(128, F_pad + 1, 128):
        if F_pad % cand != 0:
            continue
        if 2 * D * cand * itemsize + 2 * tb * cand * 4 <= budget:
            tf = cand
    return tb, tf


def rff_forward(x, w1_t, b1, w2_row, b2, *, block_b=1024,
                compute_dtype=jnp.bfloat16, act_dtype=None):
    """RFF forward.

    x:      (B, D)  float32
    w1_t:   (D, F)  float32   (PyTorch linear1.weight transposed)
    b1:     (1, F)  float32
    w2_row: (1, F)  float32   (PyTorch linear2.weight as a row)
    b2:     (1, 1)  float32
    Returns (B, 1) in x.dtype.
    """
    B, D = x.shape
    F = w1_t.shape[1]
    out_dtype = x.dtype
    if act_dtype is None:
        act_dtype = _default_act_dtype()

    # --- Pad the feature dim to a full 128-lane multiple (zero-neutral). ----
    F_pad = max(128, _round_up(F, 128))
    if F_pad != F:
        w1_t = jnp.pad(w1_t, ((0, 0), (0, F_pad - F)))
        b1 = jnp.pad(b1, ((0, 0), (0, F_pad - F)))
        w2_row = jnp.pad(w2_row, ((0, 0), (0, F_pad - F)))

    itm = jnp.dtype(compute_dtype).itemsize
    tb, tf = _pick_tiles(B, D, F_pad, block_b, itm)

    B_pad = _round_up(B, tb)
    if B_pad != B:
        x = jnp.pad(x, ((0, B_pad - B), (0, 0)))

    # --- bf16 feed for the first matmul (default); f32 accumulation. --------
    if compute_dtype != x.dtype:
        x = x.astype(compute_dtype)
        w1_t = w1_t.astype(compute_dtype)

    grid = (B_pad // tb, F_pad // tf)   # reduction (F) axis last

    # --- Explicit VMEM budget (v7x has only 64 MiB physical). ---------------
    vmem_bytes = (
        2 * tb * D * itm          # X double buffer
        + 2 * D * tf * itm        # W1 blocks
        + 4 * tf * 4              # b1 + w2 blocks
        + 2 * tb * 4              # output blocks
        + tb * 4                  # accumulator scratch
        + 2 * tb * tf * 4         # h / hw temporaries
        + (4 << 20)               # slack for compiler temporaries
    )
    vmem_limit = int(min(max(vmem_bytes, 16 << 20), 60 << 20))

    cost = pl.CostEstimate(
        flops=2 * B_pad * D * F_pad + 3 * B_pad * F_pad,
        transcendentals=B_pad * F_pad,
        bytes_accessed=(x.size * x.dtype.itemsize
                        + (B_pad // tb) * D * F_pad * itm   # W1 re-streamed per B tile
                        + b1.size * 4 + w2_row.size * 4 + 4
                        + B_pad * 4),
    )

    kernel = functools.partial(rff_kernel, act_dtype=act_dtype, tf=tf)

    out = pl.pallas_call(
        kernel,
        out_shape=jax.ShapeDtypeStruct((B_pad, 1), out_dtype),
        grid_spec=pltpu.PrefetchScalarGridSpec(
            num_scalar_prefetch=0,
            grid=grid,
            in_specs=[
                pl.BlockSpec((tb, D), lambda i, f: (i, 0)),    # X stream, pipelined
                pl.BlockSpec((D, tf), lambda i, f: (0, f)),    # W1 column block
                pl.BlockSpec((1, tf), lambda i, f: (0, f)),    # b1 block
                pl.BlockSpec((1, tf), lambda i, f: (0, f)),    # W2 row block
                pl.BlockSpec(memory_space=pltpu.MemorySpace.SMEM),  # b2 scalar
            ],
            out_specs=pl.BlockSpec((tb, 1), lambda i, f: (i, 0)),
            scratch_shapes=[pltpu.VMEM((tb, 1), jnp.float32)],
        ),
        compiler_params=pltpu.CompilerParams(
            dimension_semantics=("parallel", "arbitrary"),
            vmem_limit_bytes=vmem_limit,
        ),
        cost_estimate=cost,
    )(x, w1_t, b1, w2_row, b2)

    return out[:B]


def init_rff_params(key, num_ff, input_dim):
    """Deterministic init mimicking torch.nn.Linear default (uniform +-1/sqrt(fan_in))."""
    k1, k2, k3, k4 = jax.random.split(key, 4)
    bound1 = 1.0 / math.sqrt(input_dim)
    bound2 = 1.0 / math.sqrt(num_ff)
    # W1 stored pre-transposed (D, F); W2 stored as a (1, F) row.
    w1_t = jax.random.uniform(k1, (input_dim, num_ff), jnp.float32, -bound1, bound1)
    b1 = jax.random.uniform(k2, (1, num_ff), jnp.float32, -bound1, bound1)
    w2_row = jax.random.uniform(k3, (1, num_ff), jnp.float32, -bound2, bound2)
    b2 = jax.random.uniform(k4, (1, 1), jnp.float32, -bound2, bound2)
    return w1_t, b1, w2_row, b2


if __name__ == "__main__":
    key = jax.random.PRNGKey(0)
    k_params, k_x = jax.random.split(key)

    batch = 16          # -> two batch tiles (tb=8), exercises the parallel axis
    input_dim = 32
    num_ff = 64

    w1_t, b1, w2_row, b2 = init_rff_params(k_params, num_ff, input_dim)
    x = jax.random.normal(k_x, (batch, input_dim), jnp.float32)

    # Pure-JAX reference (same math as the PyTorch module).
    y_ref = jnp.tanh(x @ w1_t + b1) @ w2_row.T + b2

    # f32 path: tight numerical check.
    y32 = rff_forward(x, w1_t, b1, w2_row, b2,
                      compute_dtype=jnp.float32, act_dtype=jnp.float32)
    y32 = jax.block_until_ready(y32)
    assert y32.shape == (batch, 1)
    assert jnp.allclose(y32, y_ref, atol=1e-5, rtol=1e-5)

    # Production default path (bf16 MXU feed, bf16 activations on v6e/v7x).
    y = rff_forward(x, w1_t, b1, w2_row, b2)
    y = jax.block_until_ready(y)
    assert y.shape == (batch, 1)
    assert jnp.allclose(y.astype(jnp.float32), y_ref, atol=5e-2, rtol=5e-2)

    print("KERNEL_OK")
</pallas_src>

<mosaic_0001>
module attributes {stable_mosaic.version = 11 : i64} {
  func.func @rff_kernel(%arg0: i32, %arg1: i32, %arg2: memref<8x32xf32, #tpu.memory_space<vmem>>, %arg3: memref<32x128xf32, #tpu.memory_space<vmem>>, %arg4: memref<1x128xf32, #tpu.memory_space<vmem>>, %arg5: memref<1x128xf32, #tpu.memory_space<vmem>>, %arg6: memref<1x1xf32, #tpu.memory_space<smem>>, %arg7: memref<8x1xf32, #tpu.memory_space<vmem>>, %arg8: memref<8x1xf32, #tpu.memory_space<vmem>>) attributes {dimension_semantics = [#tpu.dimension_semantics<parallel>, #tpu.dimension_semantics<arbitrary>], iteration_bounds = array<i64: 2, 1>, scalar_prefetch = 0 : i64, scratch_operands = 1 : i64, tpu.core_type = #tpu.core_type<tc>, window_params = [{transform_indices = @transform_0, window_bounds = array<i64: 8, 32>}, {transform_indices = @transform_1, window_bounds = array<i64: 32, 128>}, {transform_indices = @transform_2, window_bounds = array<i64: 1, 128>}, {transform_indices = @transform_3, window_bounds = array<i64: 1, 128>}, {transform_indices = @transform_4, window_bounds = array<i64: 1, 1>}, {transform_indices = @transform_5, window_bounds = array<i64: 8, 1>}]} {
    %c0_i32 = arith.constant 0 : i32
    %0 = arith.cmpi eq, %arg1, %c0_i32 : i32
    %1 = arith.extui %0 : i1 to i32
    %c0_i32_0 = arith.constant 0 : i32
    %2 = arith.cmpi ne, %1, %c0_i32_0 : i32
    scf.if %2 {
      %cst_15 = arith.constant 0.000000e+00 : f32
      %21 = vector.broadcast %cst_15 : f32 to vector<8x1xf32>
      %c0_16 = arith.constant 0 : index
      %c0_17 = arith.constant 0 : index
      %22 = vector.load %arg8[%c0_16, %c0_17] : memref<8x1xf32, #tpu.memory_space<vmem>>, vector<8x1xf32>
      tpu.vector_store %arg8[%c0_16, %c0_17], %21 {strides = array<i32>} : memref<8x1xf32, #tpu.memory_space<vmem>>, vector<8x1xf32>,
    } else {
    }
    %c0 = arith.constant 0 : index
    %c0_1 = arith.constant 0 : index
    %3 = vector.load %arg2[%c0, %c0_1] : memref<8x32xf32, #tpu.memory_space<vmem>>, vector<8x32xf32>
    %c0_2 = arith.constant 0 : index
    %c0_3 = arith.constant 0 : index
    %4 = vector.load %arg3[%c0_2, %c0_3] : memref<32x128xf32, #tpu.memory_space<vmem>>, vector<32x128xf32>
    %cst = arith.constant dense<0.000000e+00> : vector<8x128xf32>
    %5 = tpu.matmul %3, %4, %cst {dimension_numbers = #tpu.dot_dimension_numbers<[1], [0], [0], [1], [0, 0, 1, 1], [], []>} : vector<8x32xf32>, vector<32x128xf32>, vector<8x128xf32> -> vector<8x128xf32>
    %c0_4 = arith.constant 0 : index
    %c0_5 = arith.constant 0 : index
    %6 = vector.load %arg4[%c0_4, %c0_5] : memref<1x128xf32, #tpu.memory_space<vmem>>, vector<1x128xf32>
    %7 = vector.broadcast %6 : vector<1x128xf32> to vector<8x128xf32>
    %8 = arith.addf %5, %7 : vector<8x128xf32>
    %9 = math.tanh %8 : vector<8x128xf32>
    %c0_6 = arith.constant 0 : index
    %c0_7 = arith.constant 0 : index
    %10 = vector.load %arg5[%c0_6, %c0_7] : memref<1x128xf32, #tpu.memory_space<vmem>>, vector<1x128xf32>
    %11 = vector.broadcast %10 : vector<1x128xf32> to vector<8x128xf32>
    %12 = arith.mulf %9, %11 : vector<8x128xf32>
    %c0_8 = arith.constant 0 : index
    %c0_9 = arith.constant 0 : index
    %13 = vector.load %arg8[%c0_8, %c0_9] : memref<8x1xf32, #tpu.memory_space<vmem>>, vector<8x1xf32>
    %cst_10 = arith.constant dense<0.000000e+00> : vector<8xf32>
    %14 = vector.multi_reduction <add>, %12, %cst_10 [1] : vector<8x128xf32> to vector<8xf32>
    %15 = vector.shape_cast %14 : vector<8xf32> to vector<8x1xf32>
    %16 = arith.addf %13, %15 : vector<8x1xf32>
    %c0_11 = arith.constant 0 : index
    %c0_12 = arith.constant 0 : index
    %17 = vector.load %arg8[%c0_11, %c0_12] : memref<8x1xf32, #tpu.memory_space<vmem>>, vector<8x1xf32>
    tpu.vector_store %arg8[%c0_11, %c0_12], %16 {strides = array<i32>} : memref<8x1xf32, #tpu.memory_space<vmem>>, vector<8x1xf32>,
    %c0_i32_13 = arith.constant 0 : i32
    %18 = arith.cmpi eq, %arg1, %c0_i32_13 : i32
    %19 = arith.extui %18 : i1 to i32
    %c0_i32_14 = arith.constant 0 : i32
    %20 = arith.cmpi ne, %19, %c0_i32_14 : i32
    scf.if %20 {
      %c0_15 = arith.constant 0 : index
      %c0_16 = arith.constant 0 : index
      %21 = vector.load %arg8[%c0_15, %c0_16] : memref<8x1xf32, #tpu.memory_space<vmem>>, vector<8x1xf32>
      %c0_17 = arith.constant 0 : index
      %c0_18 = arith.constant 0 : index
      %22 = memref.load %arg6[%c0_17, %c0_18] : memref<1x1xf32, #tpu.memory_space<smem>>
      %23 = vector.broadcast %22 : f32 to vector<8x1xf32>
      %24 = arith.addf %21, %23 : vector<8x1xf32>
      %c0_19 = arith.constant 0 : index
      %c0_20 = arith.constant 0 : index
      %25 = vector.load %arg7[%c0_19, %c0_20] : memref<8x1xf32, #tpu.memory_space<vmem>>, vector<8x1xf32>
      tpu.vector_store %arg7[%c0_19, %c0_20], %24 {strides = array<i32>} : memref<8x1xf32, #tpu.memory_space<vmem>>, vector<8x1xf32>,
    } else {
    }
    return
  }
  func.func @transform_0(%arg0: i32, %arg1: i32) -> (i32, i32) {
    %c0_i32 = arith.constant 0 : i32
    %c0_i32_0 = arith.constant 0 : i32
    return %arg0, %c0_i32 : i32, i32
  }
  func.func @transform_1(%arg0: i32, %arg1: i32) -> (i32, i32) {
    %c0_i32 = arith.constant 0 : i32
    %c0_i32_0 = arith.constant 0 : i32
    return %c0_i32, %arg1 : i32, i32
  }
  func.func @transform_2(%arg0: i32, %arg1: i32) -> (i32, i32) {
    %c0_i32 = arith.constant 0 : i32
    %c0_i32_0 = arith.constant 0 : i32
    return %c0_i32, %arg1 : i32, i32
  }
  func.func @transform_3(%arg0: i32, %arg1: i32) -> (i32, i32) {
    %c0_i32 = arith.constant 0 : i32
    %c0_i32_0 = arith.constant 0 : i32
    return %c0_i32, %arg1 : i32, i32
  }
  func.func @transform_4(%arg0: i32, %arg1: i32) -> (i32, i32) {
    %c0_i32 = arith.constant 0 : i32
    %c0_i32_0 = arith.constant 0 : i32
    %c0_i32_1 = arith.constant 0 : i32
    return %c0_i32, %c0_i32_0 : i32, i32
  }
  func.func @transform_5(%arg0: i32, %arg1: i32) -> (i32, i32) {
    %c0_i32 = arith.constant 0 : i32
    %c0_i32_0 = arith.constant 0 : i32
    return %arg0, %c0_i32 : i32, i32
  }
}

</mosaic_0001>

<bundles_post_ra>
// kernel: tpu_custom_call.1
= control target key start
LH: loop header
LB: loop body
LE: loop exit
PB: predicated region body
PF: predicated region fallthrough
CT: control target
= control target key end

     0   :  { %s958_s0 = inlined_call_operand.hbm [shape: f32[16,32], index: 0, kind: input, shape index: {}]   ;;  %s959_s1 = inlined_call_operand.hbm [shape: f32[32,128], index: 1, kind: input, shape index: {}]   ;;  %s960_s2 = inlined_call_operand.vmem [shape: f32[1,128], index: 2, kind: input, shape index: {}]   ;;  %s961_s3 = inlined_call_operand.vmem [shape: f32[1,128], index: 3, kind: input, shape index: {}]   ;;  %s962_s4 = inlined_call_operand.<no memory space> [shape: f32[1,1], index: 4, kind: input, shape index: {}]   ;;  %s963_s5 = inlined_call_operand.vmem [shape: f32[16,1], index: 5, kind: output, shape index: {}]  }
   0x1   :  { %10 = sst [smem:[#allocation3]] %s962_s4 }
   0x2   :  { %11 = vsyncpa [#allocation5], 0 }
   0x3   :  { %13 = vsyncpa [#allocation5 + $0x1], 0 }
   0x4   :  { %14 = vsyncpa [#allocation7], 0  ;;  %s794_s20 = smov 0   ;;  %s796_s21 = smov 0  }
   0x5   :  { %s798_s22 = smov 0   ;;  %s800_s23 = smov 0  }
   0x6   :  { %s802_s24 = smov 0   ;;  %s804_s25 = smov 0  }
   0x7 LB: > { %s527_s4 = sadd.s32 4294967295, %s752_s25   ;;  %p52_p0 = scmp.ne.s32.totalorder %s736_s21, %s732_s20  ;;  %s752_s25 = sphi %s804_s25, %s20_s25   ;;  %s748_s24 = sphi %s802_s24, %s980_s24   ;;  %s744_s23 = sphi %s800_s23, %s979_s23   ;;  %s740_s22 = sphi %s798_s22, %s978_s22   ;;  %s736_s21 = sphi %s796_s21, %s977_s21   ;;  %s732_s20 = sphi %s794_s20, %s976_s20  }
   0x8   : > { %p824_p1 = scmp.eq.s32.totalorder %s527_s4, 0  ;;  %p529_p2 = scmp.ge.s32.totalorder %s752_s25, 1 }
   0x9   : > { %p188_p3 = scmp.lt.s32.totalorder %s752_s25, 3  ;;  %s754_s29 = smov [#allocation6]  }
   0xa   : > { %s968_s26 = scalar_select %p824_p1, 1, 0 }
   0xb   : > { %p832_p4 = por %p824_p1, %p52_p0  ;;  %p836_p5 = pnand %p529_p2, %p188_p3 }
   0xc   : > { %s202_s30 = sshll.u32 %s754_s29, 4  ;;  %s32_s7 = sadd.s32 1, %s748_s24  ;;  %s203_s30 = int_to_ptr.vmem [resolvable:$true] %s202_s30 }
   0xd   : > { %s969_s27 = scalar_select %p832_p4, 1, 0 }
   0xe   : > { %s970_s28 = scalar_select %p836_p5, 1, 0 }
   0xf   : > { %p573_p6 = pneg %p836_p5  ;;  %s640_s10 = scalar_lea.hbm %s959_s1, 512 }
  0x10   : > { %p641_p8 = scmp.ne.s32.totalorder %s959_s1, %s640_s10  ;;  %p647_p12 = scmp.lt.u32.totalorder %s640_s10, %s959_s1 }
  0x11   : > { %p844_p7 = pnand %p573_p6, %p824_p1 }
  0x13   : > { %p642_p9 = pneg %p844_p7 }
  0x15   : > { %p643_p10 = pnand %p642_p9, %p641_p8 }
  0x17   : > { %p644_p11 = pneg %p643_p10 }
  0x19   : > { %p649_p13 = pnand %p647_p12, %p644_p11 }
  0x1b   : > { %652 = shalt.err (!%p649_p13)
}
  0x1c   : > { %s653_s15 = scalar_lea.vmem %s203_s30, 512  ;;  %p661_p6 = scmp.lt.s32.totalorder %s203_s30, %s203_s30 }
  0x1d   : > { %p654_p0 = scmp.ne.s32.totalorder %s203_s30, %s653_s15  ;;  %p662_p1 = scmp.lt.s32.totalorder %s653_s15, %s653_s15 }
  0x1f   : > { %p656_p2 = pnand %p654_p0, %p642_p9  ;;  %p663_p4 = por %p662_p1, %p661_p6 }
  0x21   : > { %p657_p3 = pneg %p656_p2 }
  0x23   : > { %p664_p5 = pnand %p663_p4, %p657_p3 }
  0x25   : > { %667 = shalt.err (!%p664_p5)
}
  0x26   : > { %s755_s16 = smov 128   ;;  %s756_s17 = smov 8  }
  0x27   : > { %576 = dma.hbm_to_vmem [thread:$0]  (!%p844_p7), %s959_s1, 512, %s203_s30, [#allocation7], %s755_s16, %s755_s16, %s756_s17  }
  0x28   : > { %p34_p1 = scmp.ge.s32.totalorder %s32_s7, 2  ;;  %s39_s20 = sadd.s32 1, %s740_s22 }
  0x29   : > { %p46_p4 = scmp.ne.s32.totalorder %s740_s22, %s736_s21  ;;  %p47_p5 = scmp.eq.s32.totalorder %s752_s25, 0 }
  0x2a   : > { %s982_s7 = smov (%p34_p1, %s32_s7), 0  ;;  %p582_p9 = scmp.lt.s32.totalorder %s752_s25, 2 }
  0x2b   : > { %p48_p8 = por %p47_p5, %p46_p4  ;;  %s36_s4 = ssub.s32 %s748_s24, %s982_s7 }
  0x2c   : > { %s231_s29 = sand.u32 1, %s740_s22   ;;  %p37_p10 = scmp.eq.s32.totalorder %s36_s4, 0 }
  0x2d   : > { %s534_s8 = sshll.u32 %s231_s29, 3  ;;  %s535_s9 = sshll.u32 %s748_s24, 7 }
  0x2e   : > { %s877_s10 = scalar_select %p37_p10, %s740_s22, %s39_s20  }
  0x2f   : > { %s882_s30 = scalar_lea.hbm %s958_s0, %s535_s9  ;;  %s235_s12 = scalar_lea.vmem [#allocation4], %s534_s8 }
  0x30   : > { %s242_s13 = sshll.u32 %s235_s12, 4  ;;  %p884_p7 = pnand %p582_p9, %p48_p8  ;;  %s888_s13 = int_to_ptr.vmem [resolvable:$true] %s242_s13 }
  0x31   : > { %s232_s15 = scalar_lea.sflag [#allocation5], %s231_s29  ;;  %s668_s16 = scalar_lea.hbm %s882_s30, 128 }
  0x32   : > { %p669_p11 = scmp.ne.s32.totalorder %s882_s30, %s668_s16  ;;  %p670_p12 = pneg %p884_p7 }
  0x33   : > { %s673_s19 = scalar_lea.hbm %s958_s0, 256  ;;  %p674_p2 = scmp.lt.u32.totalorder %s882_s30, %s958_s0 }
  0x34   : > { %p671_p13 = pnand %p670_p12, %p669_p11  ;;  %p675_p3 = scmp.lt.u32.totalorder %s673_s19, %s668_s16 }
  0x35   : > { %p677_p1 = scmp.lt.u32.totalorder %s668_s16, %s882_s30 }
  0x36   : > { %p672_p0 = pneg %p671_p13  ;;  %p676_p6 = por %p675_p3, %p674_p2 }
  0x38   : > { %p678_p4 = por %p677_p1, %p676_p6 }
  0x3a   : > { %p679_p5 = pnand %p678_p4, %p672_p0 }
  0x3c   : > { %682 = shalt.err (!%p679_p5)
}
  0x3d   : > { %s683_s29 = scalar_lea.vmem %s888_s13, 128  ;;  %s757_s8 = smov [#allocation4]  }
  0x3e   : > { %p684_p8 = scmp.ne.s32.totalorder %s888_s13, %s683_s29  ;;  %s688_s9 = sshll.u32 %s757_s8, 4  ;;  %s689_s9 = int_to_ptr.vmem [resolvable:$false] %s688_s9 }
  0x3f   : > { %s690_s6 = scalar_lea.vmem %s689_s9, 256  ;;  %p691_p11 = scmp.lt.s32.totalorder %s888_s13, %s689_s9 }
  0x40   : > { %p686_p9 = pnand %p684_p8, %p670_p12  ;;  %p692_p13 = scmp.lt.s32.totalorder %s690_s6, %s683_s29 }
  0x42   : > { %p687_p10 = pneg %p686_p9  ;;  %p693_p2 = por %p692_p13, %p691_p11 }
  0x44   : > { %p694_p3 = pnand %p693_p2, %p687_p10 }
  0x46   : > { %697 = shalt.err (!%p694_p3)
}
  0x47   : > { %580 = dma.hbm_to_vmem [thread:$0]  (!%p884_p7), %s882_s30, 128, %s888_s13, %s232_s15  }
  0x48   : > { %p973_p0 = scmp.ne.s32.totalorder %s970_s28, 0 }
  0x49   : > { %s253_s11 = sand.u32 (!%p973_p0), 1, %s736_s21   ;;  %p974_p12 = scmp.ne.s32.totalorder (!%p973_p0), %s969_s27, 0 }
  0x4a   : > { %251 = sbr.rel (%p973_p0) target bundleno = 478 (0x1de), region = 40  ;;  %s537_s12 = sshll.u32 (!%p973_p0), %s253_s11, 3 }
  0x4b   : > { %s254_s16 = scalar_lea.sflag (!%p973_p0), [#allocation5], %s253_s11  ;;  %s257_s17 = scalar_lea.vmem (!%p973_p0), [#allocation4], %s537_s12 }
  0x51   : > { %723 = dma.done.wait (%p974_p12), %s254_s16, 128  }
  0x52   : > { %725 = vsyncadd (%p974_p12), %s254_s16, 4294967168  ;;  %p975_p6 = scmp.ne.s32.totalorder %s968_s26, 0 }
  0x54   : > { %727 = dma.done.wait (%p975_p6), [#allocation7], 512  }
  0x55   : > { %729 = vsyncadd (%p975_p6), [#allocation7], 4294966784  ;;  %vm307_vm0 = vcmask 7168   ;;  %v758_v0 = vmov 0.0|0.0   ;;  %v759_v1 = vmov 0.0   ;;  %vm760_vm1 = vmmov 0  }
  0x56   : > { %561 = vmatprep.subr.bf16.mxu0 %v758_v0  ;;  %308 = vst.msk [vmem:[#allocation2] sm:$0xff] %vm307_vm0, %v759_v1  ;;  %558 = vmatprep.mubr.msk.f32.mxu0 %vm760_vm1, %v759_v1  ;;  %v310_v2 = vld [vmem:[#allocation6] sm:$0xff]  ;;  %v311_v3 = vld [vmem:[#allocation6 + $0x8] sm:$0xff]  ;;  %v312_v4 = vld [vmem:[#allocation6 + $0x10] sm:$0xff]  ;;  %vm321_vm2 = vcmask 261120   ;;  %p299_p7 = scmp.lt.s32.totalorder %s744_s23, 1 }
  0x57   : > { %v562_v5 = vpack.c.bf16 %v311_v3, %v310_v2  ;;  %v313_v6 = vld [vmem:[#allocation6 + $0x18] sm:$0xff]  ;;  %v540_v9 = vld [vmem:[%s960_s2] ss:$0 sm:$0xff]  ;;  %s414_s13 = sld [smem:[#allocation3]] }
  0x58   : > { %v565_v7 = vpack.c.bf16 %v313_v6, %v312_v4  ;;  %v309_v8 = vld [vmem:[%s257_s17] sm:$0xff]  ;;  %v542_v13 = vld [vmem:[%s961_s3] ss:$0 sm:$0xff]  ;;  %s984_s23 = smov (!%p299_p7, %s744_s23), 1 }
  0x59   : > { %563 = vmatpush3.bf16.msra.mxu0 %v562_v5  ;;  %s539_s14 = sshll.u32 %s984_s23, 3 }
  0x5a   : > { %564 = vmatprep.subr.bf16.mxu0 %v758_v0  ;;  %s302_s19 = scalar_lea.vmem %s963_s5, %s539_s14 }
  0x5d   : > { %566 = vmatpush3.bf16.msra.mxu0 %v565_v7  ;;  %v404_v16 = vld [vmem:[#allocation2] sm:$0xff]  ;;  %v415_v19 = vstv %s414_s13 }
  0x60   : > { %559 = vmatmul.mubr.msk.f32.vlgmr.msra.gmra.mrb[0].mxu0 %vm321_vm2, %v309_v8 }
 0x133   : > { %v391_v10 = vpop.f32.mrb[0].mxu0 }
 0x134   : > { %v392_v11 = vadd.f32 %v540_v9, %v391_v10  ;;  %v560_v12 = vpop.f32.mrb[1].mxu0 }
 0x136   : > { %638 = vtanh.f32 %v392_v11 }
 0x140   : > { %v639_v14 = vpop.eup %638 }
 0x141   : > { %v403_v15 = vmul.f32 %v639_v14, %v542_v13 }
 0x143   : > { %405 = vadd.xlane.f32.xlu0 %v403_v15 }
 0x1d0   : > { %v406_v17 = vpop.xlane.xlu0 %405 }
 0x1d1   : > { %v407_v18 = vadd.f32 %v406_v17, %v404_v16 }
 0x1d3   : > { %409 = vst.msk [vmem:[#allocation2] sm:$0xff] %vm307_vm0, %v407_v18 }
 0x1da   : > { %v413_v20 = vld [vmem:[#allocation2] sm:$0xff] }
 0x1db   : > { %v416_v21 = vadd.f32 %v415_v19, %v413_v20 }
 0x1dd   : > { %417 = vst.msk [vmem:[%s302_s19] sm:$0xff] %vm307_vm0, %v416_v21 }
 0x1de PF: > { %s20_s25 = sadd.s32 1, %s752_s25   ;;  %s976_s20 = smov %s736_s21 }
 0x1df   : > { %p17_p1 = scmp.ge.s32.totalorder %s20_s25, 4   ;;  %s977_s21 = smov %s740_s22 }
 0x1e0   : > { %s978_s22 = smov %s877_s10  ;;  %s979_s23 = smov %s748_s24 }
 0x1e1   : > { %s980_s24 = smov %s982_s7  ;;  %19 = sbr.rel (!%p17_p1) target bundleno = 7 (0x7), region = 99 }
 0x1e8   :  { %437 = vsyncpa [#allocation5], 1 }
 0x1e9   :  { %439 = vsyncpa [#allocation5 + $0x1], 1 }
 0x1ea   :  { %440 = vsyncpa [#allocation7], 1 }

</bundles_post_ra>
